<compile_context>
chip_gen: v6e
topology: v6e:2x2x1
jax: 0.10.0
libtpu: 0.0.40
codegen_flags: <defaults>
</compile_context>

<pallas_src>
import functools

import jax
import jax.numpy as jnp
from jax.experimental import pallas as pl
from jax.experimental.pallas import tpu as pltpu

_BN_EPS = 1e-5
_LANE = 128


def _emission_kernel(x_ref, w1_ref, wh_ref, vec_ref, *rest,
                     training: bool, H: int, O: int):
    """Single-block EmissionNetwork forward.

    x_ref   : (B, D)    input activations
    w1_ref  : (D, H)    first Linear weight (BN scale pre-folded in eval mode)
    wh_ref  : (H, 2*O)  fused head weight [w_mu || w_logvar]
    vec_ref : (R, W)    packed per-feature vectors
                        training: rows = [b1, gamma, beta, b_head(pad)]
                        eval:     rows = [b1_folded, b_head(pad)]
    noise   : (B, O)    standard-normal noise (training only)
    out_ref : (B, LANE) lane-dense slab: [:, :O]=output, [:, O:2O]=std,
                        [:, 2O]=log_p, rest zero.
    """
    if training:
        noise_ref, out_ref = rest
    else:
        (out_ref,) = rest

    x = x_ref[...].astype(jnp.float32)
    vec = vec_ref[...].astype(jnp.float32)
    b1 = vec[0:1, :H]

    # ---- fc: Linear (+ BatchNorm1d) + ReLU ----
    h = jnp.dot(x, w1_ref[...], preferred_element_type=jnp.float32) + b1
    if training:
        gamma = vec[1:2, :H]
        beta = vec[2:3, :H]
        bh = vec[3:4, :2 * O]
        # Two *independent* cross-sublane reduces (mean, E[h^2]); no dependent
        # second reduce on (h - mean).
        mean = jnp.mean(h, axis=0, keepdims=True)
        ex2 = jnp.mean(h * h, axis=0, keepdims=True)
        var = ex2 - mean * mean
        h = (h - mean) * jax.lax.rsqrt(var + _BN_EPS) * gamma + beta
    else:
        # BatchNorm (running stats) already folded into w1/b1 by the wrapper.
        bh = vec[1:2, :2 * O]
    z = jnp.maximum(h, 0.0)

    # ---- fused heads: one matmul + one tanh, then split ----
    heads = jnp.tanh(
        jnp.dot(z, wh_ref[...], preferred_element_type=jnp.float32) + bh)
    mu = heads[:, :O]
    logvar = heads[:, O:]
    std = jnp.exp(0.5 * logvar)

    # Zero the lane-dense output slab once (full unmasked store), then fill the
    # first 2*O+1 columns; the whole (B, 128) slab writes back in one DMA.
    out_ref[...] = jnp.zeros_like(out_ref)

    if training:
        sample = mu + std * noise_ref[...]
        output = jnp.clip(sample, -1.0, 1.0)
        diff = output - mu
        # log N(output | mu, std) using log(std) = 0.5*logvar and
        # 1/(2*var) = 0.5*exp(-logvar): saves one log and one divide.
        log_p = (-(diff * diff) * (0.5 * jnp.exp(-logvar))
                 - 0.5 * logvar
                 - 0.5 * jnp.log(2.0 * jnp.pi))
        out_ref[:, 0:O] = output
        out_ref[:, O:2 * O] = std
        out_ref[:, 2 * O:2 * O + 1] = jnp.sum(log_p, axis=1, keepdims=True)
    else:
        out_ref[:, 0:O] = mu
        out_ref[:, O:2 * O] = std
        out_ref[:, 2 * O:2 * O + 1] = jnp.ones((mu.shape[0], 1), jnp.float32)


def emission_forward(params, x, *, training: bool, rng_key=None):
    """Returns (output, std, log_p) exactly as EmissionNetwork.forward."""
    x = x.astype(jnp.float32)
    B, D = x.shape
    H = params["w1"].shape[1]
    O = params["wmu"].shape[1]
    W = max(H, 2 * O)
    lane = max(_LANE, pl.cdiv(2 * O + 1, _LANE) * _LANE)

    def pad_row(v):  # (1, n) -> (1, W)
        v = v.astype(jnp.float32)
        return jnp.pad(v, ((0, 0), (0, W - v.shape[1])))

    # Fused head parameters: [mu || logvar].
    w_head = jnp.concatenate([params["wmu"], params["wlv"]], axis=1)   # (H, 2*O)
    b_head = jnp.concatenate([params["bmu"], params["blv"]], axis=1)   # (1, 2*O)

    if training:
        w1 = params["w1"].astype(jnp.float32)
        vecs = jnp.concatenate(
            [pad_row(params["b1"]), pad_row(params["gamma"]),
             pad_row(params["beta"]), pad_row(b_head)], axis=0)        # (4, W)
        noise = jax.random.normal(rng_key, (B, O), jnp.float32)
        inputs = (x, w1, w_head.astype(jnp.float32), vecs, noise)
    else:
        # Fold BatchNorm (running stats) into the first Linear.
        scale = params["gamma"] * jax.lax.rsqrt(params["running_var"] + _BN_EPS)
        w1 = (params["w1"] * scale).astype(jnp.float32)
        b1 = (params["b1"] - params["running_mean"]) * scale + params["beta"]
        vecs = jnp.concatenate([pad_row(b1), pad_row(b_head)], axis=0)  # (2, W)
        inputs = (x, w1, w_head.astype(jnp.float32), vecs)

    def full_spec(shape):
        n = len(shape)
        return pl.BlockSpec(shape, lambda i, _n=n: (0,) * _n)

    kernel = functools.partial(_emission_kernel, training=training, H=H, O=O)

    slab = pl.pallas_call(
        kernel,
        grid=(1,),
        in_specs=[full_spec(a.shape) for a in inputs],
        out_specs=full_spec((B, lane)),
        out_shape=jax.ShapeDtypeStruct((B, lane), jnp.float32),
        compiler_params=pltpu.CompilerParams(
            dimension_semantics=("arbitrary",)),
    )(*inputs)

    output = slab[:, :O]
    std = slab[:, O:2 * O]
    log_p = slab[:, 2 * O]
    return output, std, log_p


def _reference_forward(params, x, *, training: bool, noise=None):
    """Pure-JAX reference mirroring the PyTorch module."""
    h = x @ params["w1"] + params["b1"]
    if training:
        mean = jnp.mean(h, axis=0, keepdims=True)
        var = jnp.mean((h - mean) ** 2, axis=0, keepdims=True)
    else:
        mean, var = params["running_mean"], params["running_var"]
    h = (h - mean) * jax.lax.rsqrt(var + _BN_EPS) * params["gamma"] + params["beta"]
    z = jnp.maximum(h, 0.0)
    mu = jnp.tanh(z @ params["wmu"] + params["bmu"])
    logvar = jnp.tanh(z @ params["wlv"] + params["blv"])
    std = jnp.exp(0.5 * logvar)
    if training:
        output = jnp.clip(mu + std * noise, -1.0, 1.0)
        log_p = (-((output - mu) ** 2) / (2.0 * std * std)
                 - jnp.log(std) - 0.5 * jnp.log(2.0 * jnp.pi))
        return output, std, jnp.sum(log_p, axis=1)
    return mu, std, jnp.ones((x.shape[0],), jnp.float32)


def init_params(key, input_size, hidden, output_size):
    ks = jax.random.split(key, 8)
    scale = 0.1
    return {
        "w1": scale * jax.random.normal(ks[0], (input_size, hidden), jnp.float32),
        "b1": scale * jax.random.normal(ks[1], (1, hidden), jnp.float32),
        "gamma": 1.0 + 0.05 * jax.random.normal(ks[2], (1, hidden), jnp.float32),
        "beta": 0.05 * jax.random.normal(ks[3], (1, hidden), jnp.float32),
        "running_mean": 0.1 * jax.random.normal(ks[4], (1, hidden), jnp.float32),
        "running_var": 1.0 + 0.1 * jnp.abs(
            jax.random.normal(ks[5], (1, hidden), jnp.float32)),
        "wmu": scale * jax.random.normal(ks[6], (hidden, output_size), jnp.float32),
        "bmu": jnp.zeros((1, output_size), jnp.float32),
        "wlv": scale * jax.random.normal(ks[7], (hidden, output_size), jnp.float32),
        "blv": jnp.zeros((1, output_size), jnp.float32),
    }


if __name__ == "__main__":
    B, INPUT_SIZE, HIDDEN, OUTPUT_SIZE = 8, 32, 32, 2

    key = jax.random.PRNGKey(0)
    pkey, xkey, nkey = jax.random.split(key, 3)
    params = init_params(pkey, INPUT_SIZE, HIDDEN, OUTPUT_SIZE)
    x = jax.random.normal(xkey, (B, INPUT_SIZE), jnp.float32)

    # Eval branch: output = mu, log_p = ones (deterministic).
    out_e, std_e, logp_e = emission_forward(params, x, training=False)
    jax.block_until_ready((out_e, std_e, logp_e))

    # Training branch: sample, clamp, Normal log-prob summed over dim=1.
    out_t, std_t, logp_t = emission_forward(params, x, training=True, rng_key=nkey)
    jax.block_until_ready((out_t, std_t, logp_t))

    assert out_e.shape == (B, OUTPUT_SIZE) and std_e.shape == (B, OUTPUT_SIZE)
    assert out_t.shape == (B, OUTPUT_SIZE) and std_t.shape == (B, OUTPUT_SIZE)
    assert logp_e.shape == (B,) and logp_t.shape == (B,)

    # Numerical sanity vs pure-JAX reference (same noise for the training path).
    ref_e = _reference_forward(params, x, training=False)
    noise = jax.random.normal(nkey, (B, OUTPUT_SIZE), jnp.float32)
    ref_t = _reference_forward(params, x, training=True, noise=noise)
    for got, ref in zip((out_e, std_e, logp_e, out_t, std_t, logp_t),
                        (*ref_e, *ref_t)):
        assert jnp.allclose(got, ref, atol=5e-3, rtol=5e-3), "mismatch vs reference"

    print("KERNEL_OK")
</pallas_src>

<mosaic_0001>
module attributes {stable_mosaic.version = 11 : i64} {
  func.func @_emission_kernel(%arg0: i32, %arg1: memref<8x32xf32, #tpu.memory_space<vmem>>, %arg2: memref<32x32xf32, #tpu.memory_space<vmem>>, %arg3: memref<32x4xf32, #tpu.memory_space<vmem>>, %arg4: memref<2x32xf32, #tpu.memory_space<vmem>>, %arg5: memref<8x128xf32, #tpu.memory_space<vmem>>) attributes {dimension_semantics = [#tpu.dimension_semantics<arbitrary>], iteration_bounds = array<i64: 1>, scalar_prefetch = 0 : i64, scratch_operands = 0 : i64, tpu.core_type = #tpu.core_type<tc>, window_params = [{pipeline_mode = #tpu.pipeline_mode<synchronous>, transform_indices = @transform_0, window_bounds = array<i64: 8, 32>}, {pipeline_mode = #tpu.pipeline_mode<synchronous>, transform_indices = @transform_1, window_bounds = array<i64: 32, 32>}, {pipeline_mode = #tpu.pipeline_mode<synchronous>, transform_indices = @transform_2, window_bounds = array<i64: 32, 4>}, {pipeline_mode = #tpu.pipeline_mode<synchronous>, transform_indices = @transform_3, window_bounds = array<i64: 2, 32>}, {pipeline_mode = #tpu.pipeline_mode<synchronous>, transform_indices = @transform_4, window_bounds = array<i64: 8, 128>}]} {
    %c0 = arith.constant 0 : index
    %c0_0 = arith.constant 0 : index
    %0 = vector.load %arg1[%c0, %c0_0] : memref<8x32xf32, #tpu.memory_space<vmem>>, vector<8x32xf32>
    %c0_1 = arith.constant 0 : index
    %c0_2 = arith.constant 0 : index
    %1 = vector.load %arg4[%c0_1, %c0_2] : memref<2x32xf32, #tpu.memory_space<vmem>>, vector<2x32xf32>
    %2 = vector.extract_strided_slice %1 {offsets = [0, 0], sizes = [1, 32], strides = [1, 1]} : vector<2x32xf32> to vector<1x32xf32>
    %c0_3 = arith.constant 0 : index
    %c0_4 = arith.constant 0 : index
    %3 = vector.load %arg2[%c0_3, %c0_4] : memref<32x32xf32, #tpu.memory_space<vmem>>, vector<32x32xf32>
    %cst = arith.constant dense<0.000000e+00> : vector<8x32xf32>
    %4 = tpu.matmul %0, %3, %cst {dimension_numbers = #tpu.dot_dimension_numbers<[1], [0], [0], [1], [0, 0, 1, 1], [], []>} : vector<8x32xf32>, vector<32x32xf32>, vector<8x32xf32> -> vector<8x32xf32>
    %5 = vector.broadcast %2 : vector<1x32xf32> to vector<8x32xf32>
    %6 = arith.addf %4, %5 : vector<8x32xf32>
    %7 = vector.extract_strided_slice %1 {offsets = [1, 0], sizes = [1, 4], strides = [1, 1]} : vector<2x32xf32> to vector<1x4xf32>
    %cst_5 = arith.constant 0.000000e+00 : f32
    %8 = vector.broadcast %cst_5 : f32 to vector<8x32xf32>
    %9 = arith.maximumf %6, %8 : vector<8x32xf32>
    %c0_6 = arith.constant 0 : index
    %c0_7 = arith.constant 0 : index
    %10 = vector.load %arg3[%c0_6, %c0_7] : memref<32x4xf32, #tpu.memory_space<vmem>>, vector<32x4xf32>
    %cst_8 = arith.constant dense<0.000000e+00> : vector<8x4xf32>
    %11 = tpu.matmul %9, %10, %cst_8 {dimension_numbers = #tpu.dot_dimension_numbers<[1], [0], [0], [1], [0, 0, 1, 1], [], []>} : vector<8x32xf32>, vector<32x4xf32>, vector<8x4xf32> -> vector<8x4xf32>
    %12 = vector.broadcast %7 : vector<1x4xf32> to vector<8x4xf32>
    %13 = arith.addf %11, %12 : vector<8x4xf32>
    %14 = math.tanh %13 : vector<8x4xf32>
    %15 = vector.extract_strided_slice %14 {offsets = [0, 0], sizes = [8, 2], strides = [1, 1]} : vector<8x4xf32> to vector<8x2xf32>
    %16 = vector.extract_strided_slice %14 {offsets = [0, 2], sizes = [8, 2], strides = [1, 1]} : vector<8x4xf32> to vector<8x2xf32>
    %cst_9 = arith.constant 5.000000e-01 : f32
    %17 = vector.broadcast %cst_9 : f32 to vector<8x2xf32>
    %18 = arith.mulf %17, %16 : vector<8x2xf32>
    %19 = math.exp %18 : vector<8x2xf32>
    %cst_10 = arith.constant 0.000000e+00 : f32
    %20 = vector.broadcast %cst_10 : f32 to vector<8x128xf32>
    %c0_11 = arith.constant 0 : index
    %c0_12 = arith.constant 0 : index
    %21 = vector.load %arg5[%c0_11, %c0_12] : memref<8x128xf32, #tpu.memory_space<vmem>>, vector<8x128xf32>
    tpu.vector_store %arg5[%c0_11, %c0_12], %20 {strides = array<i32>} : memref<8x128xf32, #tpu.memory_space<vmem>>, vector<8x128xf32>,
    %c0_13 = arith.constant 0 : index
    %c0_14 = arith.constant 0 : index
    %22 = vector.load %arg5[%c0_13, %c0_14] : memref<8x128xf32, #tpu.memory_space<vmem>>, vector<8x2xf32>
    tpu.vector_store %arg5[%c0_13, %c0_14], %15 {strides = array<i32>} : memref<8x128xf32, #tpu.memory_space<vmem>>, vector<8x2xf32>,
    %c0_15 = arith.constant 0 : index
    %c2 = arith.constant 2 : index
    %23 = vector.load %arg5[%c0_15, %c2] : memref<8x128xf32, #tpu.memory_space<vmem>>, vector<8x2xf32>
    tpu.vector_store %arg5[%c0_15, %c2], %19 {strides = array<i32>} : memref<8x128xf32, #tpu.memory_space<vmem>>, vector<8x2xf32>,
    %cst_16 = arith.constant 1.000000e+00 : f32
    %24 = vector.broadcast %cst_16 : f32 to vector<8x1xf32>
    %c0_17 = arith.constant 0 : index
    %c4 = arith.constant 4 : index
    %25 = vector.load %arg5[%c0_17, %c4] : memref<8x128xf32, #tpu.memory_space<vmem>>, vector<8x1xf32>
    tpu.vector_store %arg5[%c0_17, %c4], %24 {strides = array<i32>} : memref<8x128xf32, #tpu.memory_space<vmem>>, vector<8x1xf32>,
    return
  }
  func.func @transform_0(%arg0: i32) -> (i32, i32) {
    %c0_i32 = arith.constant 0 : i32
    %c0_i32_0 = arith.constant 0 : i32
    %c0_i32_1 = arith.constant 0 : i32
    return %c0_i32, %c0_i32_0 : i32, i32
  }
  func.func @transform_1(%arg0: i32) -> (i32, i32) {
    %c0_i32 = arith.constant 0 : i32
    %c0_i32_0 = arith.constant 0 : i32
    %c0_i32_1 = arith.constant 0 : i32
    return %c0_i32, %c0_i32_0 : i32, i32
  }
  func.func @transform_2(%arg0: i32) -> (i32, i32) {
    %c0_i32 = arith.constant 0 : i32
    %c0_i32_0 = arith.constant 0 : i32
    %c0_i32_1 = arith.constant 0 : i32
    return %c0_i32, %c0_i32_0 : i32, i32
  }
  func.func @transform_3(%arg0: i32) -> (i32, i32) {
    %c0_i32 = arith.constant 0 : i32
    %c0_i32_0 = arith.constant 0 : i32
    %c0_i32_1 = arith.constant 0 : i32
    return %c0_i32, %c0_i32_0 : i32, i32
  }
  func.func @transform_4(%arg0: i32) -> (i32, i32) {
    %c0_i32 = arith.constant 0 : i32
    %c0_i32_0 = arith.constant 0 : i32
    %c0_i32_1 = arith.constant 0 : i32
    return %c0_i32, %c0_i32_0 : i32, i32
  }
}

</mosaic_0001>

<bundles_post_ra>
// kernel: tpu_custom_call.1
= control target key start
LH: loop header
LB: loop body
LE: loop exit
PB: predicated region body
PF: predicated region fallthrough
CT: control target
= control target key end

     0   :  { %9 = vsyncpa [#allocation3], 0  ;;  %s374_s0 = inlined_call_operand.hbm [shape: f32[8,32], index: 0, kind: input, shape index: {}]   ;;  %s375_s1 = inlined_call_operand.vmem [shape: f32[32,32], index: 1, kind: input, shape index: {}]   ;;  %s376_s2 = inlined_call_operand.vmem [shape: f32[32,4], index: 2, kind: input, shape index: {}]   ;;  %s377_s3 = inlined_call_operand.vmem [shape: f32[2,32], index: 3, kind: input, shape index: {}]   ;;  %s378_s4 = inlined_call_operand.hbm [shape: f32[8,128], index: 4, kind: output, shape index: {}]  }
   0x1   :  { %10 = vsyncpa [#allocation4], 0  ;;  %s309_s15 = smov [#allocation2]  }
   0x2   :  { %s17_s16 = sshll.u32 %s309_s15, 4  ;;  %s18_s16 = int_to_ptr.vmem [resolvable:$true] %s17_s16 }
   0x3   :  { %s273_s17 = scalar_lea.vmem %s18_s16, 128  ;;  %p278_p1 = scmp.lt.s32.totalorder %s18_s16, %s18_s16 }
   0x4   :  { %p274_p0 = scmp.ne.s32.totalorder %s18_s16, %s273_s17  ;;  %p279_p2 = scmp.lt.s32.totalorder %s273_s17, %s273_s17 }
   0x6   :  { %p280_p3 = por %p279_p2, %p278_p1 }
   0x8   :  { %p281_p4 = pnand %p280_p3, %p274_p0 }
   0xa   :  { %284 = shalt.err (!%p281_p4)
}
   0xb   :  { %20 = dma.hbm_to_vmem [thread:$0]  %s374_s0, 128, %s18_s16, [#allocation3]  }
   0xc   :  { %305 = dma.done.wait [#allocation3], 128  }
   0xd   :  { %306 = vsyncadd [#allocation3], 4294967168  ;;  %v310_v0 = vmov 0.0   ;;  %vm311_vm0 = vmmov 0   ;;  %v35_v1 = vld [vmem:[%s375_s1 + $0x18] sm:$0xff]  ;;  %v34_v2 = vld [vmem:[%s375_s1 + $0x10] sm:$0xff]  ;;  %v36_v10 = vlaneseq }
   0xe   :  { %234 = vmatprep.subr.mxu0 %v310_v0  ;;  %200 = vst [vmem:[#allocation5] sm:$0xff] %v310_v0  ;;  %242 = vmatprep.mubr.msk.f32.mxu0 %vm311_vm0, %v310_v0  ;;  %v118_v3 = vld [vmem:[%s376_s2 + $0x18] sm:$0xff]  ;;  %v33_v4 = vld [vmem:[%s375_s1 + $0x8] sm:$0xff]  ;;  %v32_v5 = vld [vmem:[%s375_s1] sm:$0xff]  ;;  %vm40_vm1 = vcmask 261120   ;;  %vm201_vm2 = vcmask 15360  }
   0xf   :  { %245 = vmatprep.subr.mxu1 %v310_v0  ;;  %253 = vmatprep.mubr.msk.f32.mxu1 %vm311_vm0, %v310_v0  ;;  %v30_v6 = vld [vmem:[#allocation2] sm:$0xff]  ;;  %v117_v7 = vld [vmem:[%s376_s2 + $0x10] sm:$0xff]  ;;  %v116_v8 = vld [vmem:[%s376_s2 + $0x8] sm:$0xff]  ;;  %v37_v11 = vshrl.u32 %v36_v10, 7  ;;  %vm203_vm3 = vcmask 31760   ;;  %vm205_vm4 = vcmask 39968  }
  0x10   :  { %235 = vmatpush3.msra.mxu0 %v35_v1  ;;  %246 = vmatpush3.msra.mxu1 %v118_v3  ;;  %v115_v9 = vld [vmem:[%s376_s2] sm:$0xff]  ;;  %s312_s2 = smov [#allocation5]   ;;  %v313_v28 = vmov 1.0  }
  0x11   :  { %236 = vmatprep.subr.mxu0 %v310_v0  ;;  %247 = vmatprep.subr.mxu1 %v310_v0  ;;  %v38_v12 = vsub.s32 0, %v37_v11  ;;  %v31_v13 = vld [vmem:[%s377_s3] sm:$0x3]  ;;  %v121_v19 = vsub.s32 1, %v37_v11  ;;  %s213_s3 = sshll.u32 %s312_s2, 4  ;;  %s214_s3 = int_to_ptr.vmem [resolvable:$true] %s213_s3 }
  0x12   :  { %237 = vmatpush3.msra.mxu0 %v34_v2  ;;  %248 = vmatpush3.msra.mxu1 %v117_v7  ;;  %s285_s10 = scalar_lea.vmem %s214_s3, 128  ;;  %p290_p6 = scmp.lt.s32.totalorder %s214_s3, %s214_s3 }
  0x13   :  { %238 = vmatprep.subr.mxu0 %v310_v0  ;;  %249 = vmatprep.subr.mxu1 %v310_v0  ;;  %v39_v14 = vrot.slane %v31_v13, %v38_v12  ;;  %v122_v20 = vrot.slane %v31_v13, %v121_v19  ;;  %p286_p5 = scmp.ne.s32.totalorder %s214_s3, %s285_s10  ;;  %p291_p7 = scmp.lt.s32.totalorder %s285_s10, %s285_s10 }
  0x14   :  { %239 = vmatpush3.msra.mxu0 %v33_v4  ;;  %250 = vmatpush3.msra.mxu1 %v116_v8 }
  0x15   :  { %240 = vmatprep.subr.mxu0 %v310_v0  ;;  %251 = vmatprep.subr.mxu1 %v310_v0  ;;  %p292_p8 = por %p291_p7, %p290_p6 }
  0x16   :  { %241 = vmatpush3.msra.mxu0 %v32_v5  ;;  %252 = vmatpush3.msra.mxu1 %v115_v9 }
  0x17   :  { %243 = vmatmul.mubr.msk.f32.vlgmr.msra.gmra.mxu0 %vm40_vm1, %v30_v6  ;;  %p293_p9 = pnand %p292_p8, %p286_p5 }
  0xd7   :  { %v110_v15 = vpop.f32.mrf.mxu0 }
  0xd8   :  { %v111_v16 = vadd.f32 %v110_v15, %v39_v14 }
  0xd9   :  { %v244_v17 = vpop.f32.mrf.mxu0 }
  0xda   :  { %v114_v18 = vmax.f32 %v111_v16, 0.0 }
  0xdc   :  { %254 = vmatmul.mubr.msk.f32.vlgmr.msra.gmra.mxu1 %vm40_vm1, %v114_v18 }
 0x19c   :  { %v192_v21 = vpop.f32.mrf.mxu1 }
 0x19d   :  { %v193_v22 = vadd.f32 %v192_v21, %v122_v20 }
 0x19e   :  { %v255_v23 = vpop.f32.mrf.mxu1 }
 0x19f   :  { %261 = vtanh.f32 %v193_v22 }
 0x1ac   :  { %v262_v24 = vpop.eup %261 }
 0x1ad   :  { %v197_v25 = vmul.f32 0.5, %v262_v24  ;;  %202 = vst.msk [vmem:[#allocation5] sm:$0xff] %vm201_vm2, %v262_v24 }
 0x1af   :  { %v198_v26 = vmul.f32 1.442695, %v197_v25 }
 0x1b1   :  { %263 = vpow2.f32 %v198_v26 }
 0x1be   :  { %v264_v27 = vpop.eup %263 }
 0x1bf   :  { %204 = vst.msk [vmem:[#allocation5] sm:$0xff] %vm203_vm3, %v264_v27 }
 0x1c0   :  { %206 = vst.msk [vmem:[#allocation5] sm:$0xff] %vm205_vm4, %v313_v28 }
 0x1c1   :  { %296 = shalt.err (!%p293_p9)
}
 0x1c2   :  { %216 = dma.vmem_to_hbm [thread:$0]  %s214_s3, 128, %s378_s4, [#allocation4]  }
 0x1c3   :  { %307 = dma.done.wait [#allocation4], 128  }
 0x1c4   :  { %308 = vsyncadd [#allocation4], 4294967168 }
 0x1c5   :  { %220 = vsyncpa [#allocation3], 1 }
 0x1c6   :  { %221 = vsyncpa [#allocation4], 1 }

</bundles_post_ra>
